<compile_context>
chip_gen: v7x
topology: tpu7x:2x2x1
jax: 0.10.0
libtpu: 0.0.40
codegen_flags: <defaults>
</compile_context>

<pallas_src>
import functools

import jax
import jax.numpy as jnp
from jax import lax
from jax.experimental import pallas as pl
from jax.experimental.pallas import tpu as pltpu


def _round_up(x, m):
    return (x + m - 1) // m * m


def _vmem_capacity_bytes():
    try:
        info = pltpu.get_tpu_info()
        cap = getattr(info, "vmem_capacity_bytes", None)
        if cap:
            return int(cap)
    except Exception:
        pass
    return 64 * 1024 * 1024   # conservative fallback (v7x per-TC VMEM)


def _conv_gelu_pool_kernel(x_ref, ind_ref, w_ref, out_ref, patches_ref, *,
                           cin, k, kp, tp, np_tiles, offs, inv_p,
                           num_cores, tiles_per_core, unroll):
    # x_ref:       (1, Cin, HWp)  f32   flattened, halo-padded image
    # ind_ref:     (1, HWp)       f32   valid-output indicator (bias carrier)
    # w_ref:       (Cout, Kp)     f32   weight cols in (i,j,ci) order; col K = bias
    # out_ref:     (1, Cout, 1)   f32   per-(image, core) partial mean
    # patches_ref: (Kp, TP)       f32   VMEM patch scratch
    cout = w_ref.shape[0]

    # Padding rows K+1..Kp-1 are never written by the tile loop; zero them once
    # per grid step so the (zero) weight columns never meet stale VMEM.
    if kp > k + 1:
        patches_ref[k + 1:kp, :] = jnp.zeros((kp - k - 1, tp), jnp.float32)

    def tile_partial(start):
        # Valid-output indicator for this tile (also the bias indicator row).
        ind_t = ind_ref[:, pl.ds(start, tp)]                        # (1, tp)
        # Fused im2col: kh*kw shifted lane-slices of the flattened image.
        for idx, off in enumerate(offs):
            patches_ref[idx * cin:(idx + 1) * cin, :] = (
                x_ref[0, :, pl.ds(start + off, tp)])
        patches_ref[k:k + 1, :] = ind_t
        # Conv (+ bias, via the indicator row) as one MXU matmul, f32 accumulation.
        y = jnp.dot(w_ref[...], patches_ref[...],
                    preferred_element_type=jnp.float32)             # (cout, tp)
        y = y * ind_t                                               # zero invalid / halo columns
        # tanh-approx GELU (same constants as the reference CUDA kernel).
        c0 = jnp.float32(0.7978845608)
        c1 = jnp.float32(0.044715)
        g = 0.5 * y * (1.0 + jnp.tanh(c0 * (y + c1 * y * y * y)))
        # Partial global-average-pool: sum along the lane (spatial) axis.
        return jnp.sum(g, axis=1, keepdims=True)                    # (cout, 1)

    acc0 = jnp.zeros((cout, 1), jnp.float32)
    if num_cores == 1:
        if unroll:  # static starts -> aligned, fully unrolled (small images)
            acc = acc0
            for t in range(np_tiles):
                acc = acc + tile_partial(t * tp)
        else:
            acc = lax.fori_loop(
                0, np_tiles,
                lambda t, a: a + tile_partial(pl.multiple_of(t * tp, 128)),
                acc0)
    else:
        # Split the tile range across the core axis so both v7x TensorCores
        # have work even when the batch alone cannot feed them.
        cid = pl.program_id(1)
        lo = cid * tiles_per_core
        hi = jnp.minimum(lo + tiles_per_core, np_tiles)
        acc = lax.fori_loop(
            lo, hi,
            lambda t, a: a + tile_partial(pl.multiple_of(t * tp, 128)),
            acc0)

    out_ref[...] = (acc * jnp.float32(inv_p)).reshape(1, cout, 1)


@jax.jit
def conv_gelu_pool(x, weight, bias):
    """x: (B, Cin, H, W) f32, weight: (Cout, Cin, kh, kw), bias: (Cout,) -> (B, Cout) f32."""
    B, Cin, H, W = x.shape
    Cout, _, kh, kw = weight.shape
    OH, OW = H - kh + 1, W - kw + 1
    P = OH * OW                                 # valid output pixels per image
    K = Cin * kh * kw
    Kp = _round_up(K + 1, 8)                    # +1 indicator/bias row, sublane-aligned
    max_off = (kh - 1) * W + (kw - 1)           # largest flattened shift
    p_span = (OH - 1) * W + OW                  # exclusive bound of valid flattened positions

    # ---- VMEM-budgeted spatial tile (per-generation via get_tpu_info) ----
    vmem_cap = _vmem_capacity_bytes()
    vmem_limit = min(vmem_cap * 3 // 4, 100 * 1024 * 1024)
    hw_est = _round_up(H * W + max_off, 128)
    fixed_bytes = (2 * Cin * hw_est + 2 * hw_est + Cout * Kp) * 4   # dbl-buffered x + ind + weights
    per_lane_bytes = (Kp + 4 * Cout) * 4                            # patch scratch + f32 temporaries
    tp_budget = (vmem_limit // 2 - fixed_bytes) // per_lane_bytes
    TP = max(128, min(_round_up(p_span, 128), tp_budget // 128 * 128, 8192))
    NP = pl.cdiv(p_span, TP)
    HWp = _round_up(NP * TP + max_off, 128)     # halo keeps every shifted slice in bounds

    # Keep both TensorCores busy when the batch axis alone can't (odd / unit batch).
    NCS = 2 if (B % 2 == 1 and NP >= 2) else 1
    tiles_per_core = pl.cdiv(NP, NCS)
    unroll = (NCS == 1 and NP <= 8)

    # Flattened + halo-padded input: ~1x copy of x, no kh*kw im2col inflation.
    x_flat = jnp.pad(x.reshape(B, Cin, H * W),
                     ((0, 0), (0, 0), (0, HWp - H * W)))

    # Valid-output indicator over the flattened spatial axis (constant-folded by XLA).
    pos = jnp.arange(HWp, dtype=jnp.int32)
    ind = ((pos < OH * W) & (pos % W < OW)).astype(jnp.float32).reshape(1, HWp)

    # Weight columns in (i, j, ci) order to match the in-kernel patch rows;
    # column K carries the bias (paired with the indicator row), rest zero.
    w_mat = jnp.transpose(weight, (0, 2, 3, 1)).reshape(Cout, K)
    w_mat = jnp.concatenate(
        [w_mat, bias.reshape(Cout, 1), jnp.zeros((Cout, Kp - K - 1), jnp.float32)],
        axis=1)                                                     # (Cout, Kp)

    offs = tuple(i * W + j for i in range(kh) for j in range(kw))

    kernel = functools.partial(
        _conv_gelu_pool_kernel, cin=Cin, k=K, kp=Kp, tp=TP, np_tiles=NP,
        offs=offs, inv_p=1.0 / P, num_cores=NCS,
        tiles_per_core=tiles_per_core, unroll=unroll)

    cost = pl.CostEstimate(
        flops=2 * B * Cout * Kp * NP * TP + 10 * B * Cout * NP * TP,
        transcendentals=B * Cout * NP * TP,
        bytes_accessed=(x_flat.size + ind.size + w_mat.size + B * NCS * Cout) * 4)

    out = pl.pallas_call(
        kernel,
        out_shape=jax.ShapeDtypeStruct((B * NCS, Cout, 1), jnp.float32),
        grid_spec=pltpu.PrefetchScalarGridSpec(
            num_scalar_prefetch=0,
            grid=(B, NCS),
            in_specs=[
                pl.BlockSpec((1, Cin, HWp), lambda b, c: (b, 0, 0)),
                pl.BlockSpec((1, HWp), lambda b, c: (0, 0)),
                pl.BlockSpec((Cout, Kp), lambda b, c: (0, 0)),
            ],
            out_specs=pl.BlockSpec((1, Cout, 1), lambda b, c: (b * NCS + c, 0, 0)),
            scratch_shapes=[pltpu.VMEM((Kp, TP), jnp.float32)],
        ),
        compiler_params=pltpu.CompilerParams(
            dimension_semantics=("parallel", "parallel"),
            vmem_limit_bytes=int(vmem_limit)),
        cost_estimate=cost,
    )(x_flat, ind, w_mat)

    out = out.reshape(B, NCS, Cout)
    return out[:, 0, :] if NCS == 1 else out.sum(axis=1)


def _reference(x, weight, bias):
    # Pure-JAX reference (matches the PyTorch module's forward).
    y = lax.conv_general_dilated(
        x, weight, window_strides=(1, 1), padding="VALID",
        dimension_numbers=("NCHW", "OIHW", "NCHW"))
    y = y + bias.reshape(1, -1, 1, 1)
    c0, c1 = 0.7978845608, 0.044715
    y = 0.5 * y * (1.0 + jnp.tanh(c0 * (y + c1 * y * y * y)))
    return jnp.mean(y, axis=(2, 3))


if __name__ == "__main__":
    in_channels, out_channels, kernel_size = 3, 16, 3
    B, H, W = 2, 16, 16

    key = jax.random.PRNGKey(0)
    kx, kwt, kb = jax.random.split(key, 3)

    # Deterministic parameter init (uniform, like PyTorch's default Conv2d init).
    fan_in = in_channels * kernel_size * kernel_size
    bound = 1.0 / (fan_in ** 0.5)
    weight = jax.random.uniform(
        kwt, (out_channels, in_channels, kernel_size, kernel_size),
        minval=-bound, maxval=bound, dtype=jnp.float32)
    bias = jax.random.uniform(
        kb, (out_channels,), minval=-bound, maxval=bound, dtype=jnp.float32)

    x = jax.random.normal(kx, (B, in_channels, H, W), dtype=jnp.float32)

    out = jax.block_until_ready(conv_gelu_pool(x, weight, bias))
    ref = jax.block_until_ready(_reference(x, weight, bias))

    assert out.shape == (B, out_channels)
    err = float(jnp.max(jnp.abs(out - ref)))
    assert err < 1e-3, f"max abs err {err}"

    print("KERNEL_OK")
</pallas_src>

<mosaic_0001>
module attributes {stable_mosaic.version = 11 : i64} {
  func.func @_conv_gelu_pool_kernel(%arg0: i32, %arg1: i32, %arg2: memref<1x3x384xf32, #tpu.memory_space<vmem>>, %arg3: memref<1x384xf32, #tpu.memory_space<vmem>>, %arg4: memref<16x32xf32, #tpu.memory_space<vmem>>, %arg5: memref<1x16x1xf32, #tpu.memory_space<vmem>>, %arg6: memref<32x256xf32, #tpu.memory_space<vmem>>) attributes {dimension_semantics = [#tpu.dimension_semantics<parallel>, #tpu.dimension_semantics<parallel>], iteration_bounds = array<i64: 2, 1>, scalar_prefetch = 0 : i64, scratch_operands = 1 : i64, tpu.core_type = #tpu.core_type<tc>, window_params = [{transform_indices = @transform_0, window_bounds = array<i64: 1, 3, 384>}, {pipeline_mode = #tpu.pipeline_mode<synchronous>, transform_indices = @transform_1, window_bounds = array<i64: 1, 384>}, {pipeline_mode = #tpu.pipeline_mode<synchronous>, transform_indices = @transform_2, window_bounds = array<i64: 16, 32>}, {transform_indices = @transform_3, window_bounds = array<i64: 1, 16, 1>}]} {
    %cst = arith.constant 0.000000e+00 : f32
    %0 = vector.broadcast %cst : f32 to vector<4x256xf32>
    %c28 = arith.constant 28 : index
    %c0 = arith.constant 0 : index
    %1 = vector.load %arg6[%c28, %c0] : memref<32x256xf32, #tpu.memory_space<vmem>>, vector<4x256xf32>
    tpu.vector_store %arg6[%c28, %c0], %0 {strides = array<i32>} : memref<32x256xf32, #tpu.memory_space<vmem>>, vector<4x256xf32>,
    %cst_0 = arith.constant 0.000000e+00 : f32
    %2 = vector.broadcast %cst_0 : f32 to vector<16x1xf32>
    %c0_1 = arith.constant 0 : index
    %c0_2 = arith.constant 0 : index
    %3 = vector.load %arg3[%c0_1, %c0_2] : memref<1x384xf32, #tpu.memory_space<vmem>>, vector<1x256xf32>
    %c0_3 = arith.constant 0 : index
    %c0_4 = arith.constant 0 : index
    %c0_5 = arith.constant 0 : index
    %4 = vector.load %arg2[%c0_3, %c0_4, %c0_5] : memref<1x3x384xf32, #tpu.memory_space<vmem>>, vector<1x3x256xf32>
    %5 = vector.shape_cast %4 : vector<1x3x256xf32> to vector<3x256xf32>
    %c0_6 = arith.constant 0 : index
    %c0_7 = arith.constant 0 : index
    %6 = vector.load %arg6[%c0_6, %c0_7] : memref<32x256xf32, #tpu.memory_space<vmem>>, vector<3x256xf32>
    tpu.vector_store %arg6[%c0_6, %c0_7], %5 {strides = array<i32>} : memref<32x256xf32, #tpu.memory_space<vmem>>, vector<3x256xf32>,
    %c0_8 = arith.constant 0 : index
    %c0_9 = arith.constant 0 : index
    %c1 = arith.constant 1 : index
    %7 = vector.load %arg2[%c0_8, %c0_9, %c1] : memref<1x3x384xf32, #tpu.memory_space<vmem>>, vector<1x3x256xf32>
    %8 = vector.shape_cast %7 : vector<1x3x256xf32> to vector<3x256xf32>
    %c3 = arith.constant 3 : index
    %c0_10 = arith.constant 0 : index
    %9 = vector.load %arg6[%c3, %c0_10] : memref<32x256xf32, #tpu.memory_space<vmem>>, vector<3x256xf32>
    tpu.vector_store %arg6[%c3, %c0_10], %8 {strides = array<i32>} : memref<32x256xf32, #tpu.memory_space<vmem>>, vector<3x256xf32>,
    %c0_11 = arith.constant 0 : index
    %c0_12 = arith.constant 0 : index
    %c2 = arith.constant 2 : index
    %10 = vector.load %arg2[%c0_11, %c0_12, %c2] : memref<1x3x384xf32, #tpu.memory_space<vmem>>, vector<1x3x256xf32>
    %11 = vector.shape_cast %10 : vector<1x3x256xf32> to vector<3x256xf32>
    %c6 = arith.constant 6 : index
    %c0_13 = arith.constant 0 : index
    %12 = vector.load %arg6[%c6, %c0_13] : memref<32x256xf32, #tpu.memory_space<vmem>>, vector<3x256xf32>
    tpu.vector_store %arg6[%c6, %c0_13], %11 {strides = array<i32>} : memref<32x256xf32, #tpu.memory_space<vmem>>, vector<3x256xf32>,
    %c0_14 = arith.constant 0 : index
    %c0_15 = arith.constant 0 : index
    %c16 = arith.constant 16 : index
    %13 = vector.load %arg2[%c0_14, %c0_15, %c16] : memref<1x3x384xf32, #tpu.memory_space<vmem>>, vector<1x3x256xf32>
    %14 = vector.shape_cast %13 : vector<1x3x256xf32> to vector<3x256xf32>
    %c9 = arith.constant 9 : index
    %c0_16 = arith.constant 0 : index
    %15 = vector.load %arg6[%c9, %c0_16] : memref<32x256xf32, #tpu.memory_space<vmem>>, vector<3x256xf32>
    tpu.vector_store %arg6[%c9, %c0_16], %14 {strides = array<i32>} : memref<32x256xf32, #tpu.memory_space<vmem>>, vector<3x256xf32>,
    %c0_17 = arith.constant 0 : index
    %c0_18 = arith.constant 0 : index
    %c17 = arith.constant 17 : index
    %16 = vector.load %arg2[%c0_17, %c0_18, %c17] : memref<1x3x384xf32, #tpu.memory_space<vmem>>, vector<1x3x256xf32>
    %17 = vector.shape_cast %16 : vector<1x3x256xf32> to vector<3x256xf32>
    %c12 = arith.constant 12 : index
    %c0_19 = arith.constant 0 : index
    %18 = vector.load %arg6[%c12, %c0_19] : memref<32x256xf32, #tpu.memory_space<vmem>>, vector<3x256xf32>
    tpu.vector_store %arg6[%c12, %c0_19], %17 {strides = array<i32>} : memref<32x256xf32, #tpu.memory_space<vmem>>, vector<3x256xf32>,
    %c0_20 = arith.constant 0 : index
    %c0_21 = arith.constant 0 : index
    %c18 = arith.constant 18 : index
    %19 = vector.load %arg2[%c0_20, %c0_21, %c18] : memref<1x3x384xf32, #tpu.memory_space<vmem>>, vector<1x3x256xf32>
    %20 = vector.shape_cast %19 : vector<1x3x256xf32> to vector<3x256xf32>
    %c15 = arith.constant 15 : index
    %c0_22 = arith.constant 0 : index
    %21 = vector.load %arg6[%c15, %c0_22] : memref<32x256xf32, #tpu.memory_space<vmem>>, vector<3x256xf32>
    tpu.vector_store %arg6[%c15, %c0_22], %20 {strides = array<i32>} : memref<32x256xf32, #tpu.memory_space<vmem>>, vector<3x256xf32>,
    %c0_23 = arith.constant 0 : index
    %c0_24 = arith.constant 0 : index
    %c32 = arith.constant 32 : index
    %22 = vector.load %arg2[%c0_23, %c0_24, %c32] : memref<1x3x384xf32, #tpu.memory_space<vmem>>, vector<1x3x256xf32>
    %23 = vector.shape_cast %22 : vector<1x3x256xf32> to vector<3x256xf32>
    %c18_25 = arith.constant 18 : index
    %c0_26 = arith.constant 0 : index
    %24 = vector.load %arg6[%c18_25, %c0_26] : memref<32x256xf32, #tpu.memory_space<vmem>>, vector<3x256xf32>
    tpu.vector_store %arg6[%c18_25, %c0_26], %23 {strides = array<i32>} : memref<32x256xf32, #tpu.memory_space<vmem>>, vector<3x256xf32>,
    %c0_27 = arith.constant 0 : index
    %c0_28 = arith.constant 0 : index
    %c33 = arith.constant 33 : index
    %25 = vector.load %arg2[%c0_27, %c0_28, %c33] : memref<1x3x384xf32, #tpu.memory_space<vmem>>, vector<1x3x256xf32>
    %26 = vector.shape_cast %25 : vector<1x3x256xf32> to vector<3x256xf32>
    %c21 = arith.constant 21 : index
    %c0_29 = arith.constant 0 : index
    %27 = vector.load %arg6[%c21, %c0_29] : memref<32x256xf32, #tpu.memory_space<vmem>>, vector<3x256xf32>
    tpu.vector_store %arg6[%c21, %c0_29], %26 {strides = array<i32>} : memref<32x256xf32, #tpu.memory_space<vmem>>, vector<3x256xf32>,
    %c0_30 = arith.constant 0 : index
    %c0_31 = arith.constant 0 : index
    %c34 = arith.constant 34 : index
    %28 = vector.load %arg2[%c0_30, %c0_31, %c34] : memref<1x3x384xf32, #tpu.memory_space<vmem>>, vector<1x3x256xf32>
    %29 = vector.shape_cast %28 : vector<1x3x256xf32> to vector<3x256xf32>
    %c24 = arith.constant 24 : index
    %c0_32 = arith.constant 0 : index
    %30 = vector.load %arg6[%c24, %c0_32] : memref<32x256xf32, #tpu.memory_space<vmem>>, vector<3x256xf32>
    tpu.vector_store %arg6[%c24, %c0_32], %29 {strides = array<i32>} : memref<32x256xf32, #tpu.memory_space<vmem>>, vector<3x256xf32>,
    %c27 = arith.constant 27 : index
    %c0_33 = arith.constant 0 : index
    %31 = vector.load %arg6[%c27, %c0_33] : memref<32x256xf32, #tpu.memory_space<vmem>>, vector<1x256xf32>
    tpu.vector_store %arg6[%c27, %c0_33], %3 {strides = array<i32>} : memref<32x256xf32, #tpu.memory_space<vmem>>, vector<1x256xf32>,
    %c0_34 = arith.constant 0 : index
    %c0_35 = arith.constant 0 : index
    %32 = vector.load %arg4[%c0_34, %c0_35] : memref<16x32xf32, #tpu.memory_space<vmem>>, vector<16x32xf32>
    %c0_36 = arith.constant 0 : index
    %c0_37 = arith.constant 0 : index
    %33 = vector.load %arg6[%c0_36, %c0_37] : memref<32x256xf32, #tpu.memory_space<vmem>>, vector<32x256xf32>
    %cst_38 = arith.constant dense<0.000000e+00> : vector<16x256xf32>
    %34 = tpu.matmul %32, %33, %cst_38 {dimension_numbers = #tpu.dot_dimension_numbers<[1], [0], [0], [1], [0, 0, 1, 1], [], []>} : vector<16x32xf32>, vector<32x256xf32>, vector<16x256xf32> -> vector<16x256xf32>
    %35 = vector.broadcast %3 : vector<1x256xf32> to vector<16x256xf32>
    %36 = arith.mulf %34, %35 : vector<16x256xf32>
    %cst_39 = arith.constant 5.000000e-01 : f32
    %37 = vector.broadcast %cst_39 : f32 to vector<16x256xf32>
    %38 = arith.mulf %37, %36 : vector<16x256xf32>
    %cst_40 = arith.constant 4.471500e-02 : f32
    %39 = vector.broadcast %cst_40 : f32 to vector<16x256xf32>
    %40 = arith.mulf %39, %36 : vector<16x256xf32>
    %41 = arith.mulf %40, %36 : vector<16x256xf32>
    %42 = arith.mulf %41, %36 : vector<16x256xf32>
    %43 = arith.addf %36, %42 : vector<16x256xf32>
    %cst_41 = arith.constant 0.797884583 : f32
    %44 = vector.broadcast %cst_41 : f32 to vector<16x256xf32>
    %45 = arith.mulf %44, %43 : vector<16x256xf32>
    %46 = math.tanh %45 : vector<16x256xf32>
    %cst_42 = arith.constant 1.000000e+00 : f32
    %47 = vector.broadcast %cst_42 : f32 to vector<16x256xf32>
    %48 = arith.addf %47, %46 : vector<16x256xf32>
    %49 = arith.mulf %38, %48 : vector<16x256xf32>
    %cst_43 = arith.constant dense<0.000000e+00> : vector<16xf32>
    %50 = vector.multi_reduction <add>, %49, %cst_43 [1] : vector<16x256xf32> to vector<16xf32>
    %51 = vector.shape_cast %50 : vector<16xf32> to vector<16x1xf32>
    %52 = arith.addf %2, %51 : vector<16x1xf32>
    %cst_44 = arith.constant 0.00510204071 : f32
    %53 = vector.broadcast %cst_44 : f32 to vector<16x1xf32>
    %54 = arith.mulf %52, %53 : vector<16x1xf32>
    %55 = vector.shape_cast %54 : vector<16x1xf32> to vector<1x16x1xf32>
    %c0_45 = arith.constant 0 : index
    %c0_46 = arith.constant 0 : index
    %c0_47 = arith.constant 0 : index
    %56 = vector.load %arg5[%c0_45, %c0_46, %c0_47] : memref<1x16x1xf32, #tpu.memory_space<vmem>>, vector<1x16x1xf32>
    tpu.vector_store %arg5[%c0_45, %c0_46, %c0_47], %55 {strides = array<i32>} : memref<1x16x1xf32, #tpu.memory_space<vmem>>, vector<1x16x1xf32>,
    return
  }
  func.func @transform_0(%arg0: i32, %arg1: i32) -> (i32, i32, i32) {
    %c0_i32 = arith.constant 0 : i32
    %c0_i32_0 = arith.constant 0 : i32
    %c0_i32_1 = arith.constant 0 : i32
    return %arg0, %c0_i32, %c0_i32_0 : i32, i32, i32
  }
  func.func @transform_1(%arg0: i32, %arg1: i32) -> (i32, i32) {
    %c0_i32 = arith.constant 0 : i32
    %c0_i32_0 = arith.constant 0 : i32
    %c0_i32_1 = arith.constant 0 : i32
    return %c0_i32, %c0_i32_0 : i32, i32
  }
  func.func @transform_2(%arg0: i32, %arg1: i32) -> (i32, i32) {
    %c0_i32 = arith.constant 0 : i32
    %c0_i32_0 = arith.constant 0 : i32
    %c0_i32_1 = arith.constant 0 : i32
    return %c0_i32, %c0_i32_0 : i32, i32
  }
  func.func @transform_3(%arg0: i32, %arg1: i32) -> (i32, i32, i32) {
    %c1_i32 = arith.constant 1 : i32
    %0 = arith.muli %arg0, %c1_i32 : i32
    %1 = arith.addi %0, %arg1 : i32
    %c0_i32 = arith.constant 0 : i32
    %c0_i32_0 = arith.constant 0 : i32
    %c0_i32_1 = arith.constant 0 : i32
    return %1, %c0_i32, %c0_i32_0 : i32, i32, i32
  }
}

</mosaic_0001>

<bundles_post_ra>
// kernel: conv_gelu_pool.1
= control target key start
LH: loop header
LB: loop body
LE: loop exit
PB: predicated region body
PF: predicated region fallthrough
CT: control target
= control target key end

     0   :  { %s726_s12 = smov 0   ;;  %s728_s13 = smov 0   ;;  %s819_s0 = inlined_call_operand.vmem [shape: f32[2,3,384], index: 0, kind: input, shape index: {}]   ;;  %s820_s1 = inlined_call_operand.vmem [shape: f32[1,384], index: 1, kind: input, shape index: {}]   ;;  %s821_s2 = inlined_call_operand.vmem [shape: f32[16,32], index: 2, kind: input, shape index: {}]   ;;  %s822_s3 = inlined_call_operand.vmem [shape: f32[2,16,1], index: 3, kind: output, shape index: {}]  }
   0x1   :  { %s730_s14 = smov 0  }
   0x2 LB: > { %s25_s15 = sadd.s32 1, %s691_s13  ;;  %p600_p0 = scmp.ge.s32.totalorder %s695_s14, 1  ;;  %s695_s14 = sphi %s730_s14, %s13_s14   ;;  %s691_s13 = sphi %s728_s13, %s824_s13   ;;  %s687_s12 = sphi %s726_s12, %s823_s12  }
   0x3   : > { %p27_p1 = scmp.ge.s32.totalorder %s25_s15, 2  ;;  %p151_p2 = scmp.lt.s32.totalorder %s695_s14, 3 }
   0x5   : > { %s826_s15 = smov (%p27_p1, %s25_s15), 0  ;;  %p152_p3 = pnand %p600_p0, %p151_p2 }
   0x6   : > { %p176_p4 = scmp.lt.s32.totalorder (!%p152_p3), %s687_s12, 1  ;;  %s697_s20 = smov (!%p152_p3), 111   ;;  %v364_v33 = vlaneseq (!%p152_p3)  ;;  %v778_v36 = vld [vmem:[%s820_s1] sm:$0x3] (!%p152_p3)  ;;  %v702_v38 = vmov (!%p152_p3), 0.0   ;;  %vm211_vm1 = vcmask (!%p152_p3), 1039360  }
   0x7   : > { %155 = sbr.rel (%p152_p3) target bundleno = 583 (0x247), region = 32  ;;  %s698_s21 = smov (!%p152_p3), 126   ;;  %189 = vst [vmem:[#allocation2 + $0x38] sm:$0xf0] (!%p152_p3), %v702_v38  ;;  %188 = vst [vmem:[#allocation2 + $0x30] sm:$0xf0] (!%p152_p3), %v702_v38  ;;  %452 = vmatprep.mubr.f32.mxu0 (!%p152_p3), %v702_v38  ;;  %458 = vmatprep.mubr.f32.mxu1 (!%p152_p3), %v702_v38 }
   0x8   : > { %s699_s22 = smov (!%p152_p3), 127   ;;  %s700_s23 = smov (!%p152_p3), 112   ;;  %vm366_vm0 = vcmp.lt.s32.totalorder (!%p152_p3), %v364_v33, 256  ;;  %vm274_vm2 = vcmask (!%p152_p3), 908288   ;;  %vm255_vm3 = vcmask (!%p152_p3), 916480   ;;  %vm232_vm4 = vcmask (!%p152_p3), 1031168  }
   0x9   : > { %s701_s24 = smov (!%p152_p3), 110   ;;  %369 = vst.msk [vmem:[#allocation2 + $0x33] ss:$8 sm:$0x3] (!%p152_p3), %vm366_vm0, %v778_v36  ;;  %s703_s27 = smov (!%p152_p3), 96   ;;  %vm295_vm5 = vcmask (!%p152_p3), 900096  }
   0xa   : > { %s704_s28 = smov (!%p152_p3), 95   ;;  %s705_s29 = smov (!%p152_p3), 94   ;;  %vm318_vm6 = vcmask (!%p152_p3), 785408   ;;  %vm339_vm7 = vcmask (!%p152_p3), 777216   ;;  %vm357_vm8 = vcmask (!%p152_p3), 769024   ;;  %vm381_vm9 = vcmask (!%p152_p3), 261120  }
   0xb   : > { %v372_v38 = vld [vmem:[%s821_s2 + $0x8] sm:$0xff] (!%p152_p3)  ;;  %vm526_vm10 = vcmask (!%p152_p3), 7168  }
   0xe   : > { %s828_s12 = smov (!%p176_p4, %s687_s12), 1 }
   0xf   : > { %s621_s16 = smul.u32 12, %s828_s12  ;;  %s608_s7 = sshll.u32 %s828_s12, 4 }
  0x10   : > { %s186_s10 = scalar_lea.vmem %s822_s3, %s608_s7 }
  0x11   : > { %s750_s19 = scalar_lea.vmem %s819_s0, %s621_s16 }
  0x12   : > { %v262_v0 = vld [vmem:[%s750_s19] sm:$0x77]  ;;  %v219_v1 = vld [vmem:[%s750_s19 + $0x8] sm:$0x7] }
  0x13   : > { %v198_v2 = vld [vmem:[%s750_s19 + $0x8] sm:$0x7]  ;;  %270 = vrot.lane.b32.xlu0 %v262_v0, %s697_s20  ;;  %v225_v3 = vrot.slane %v219_v1, 2  ;;  %v197_v6 = vld [vmem:[%s750_s19] sm:$0x77]  ;;  %v266_v28 = vcombine.low %v262_v0, %v262_v0 }
  0x14   : > { %v204_v4 = vrot.slane %v198_v2, 5  ;;  %v242_v5 = vld [vmem:[%s750_s19 + $0x8] sm:$0x7]  ;;  %v201_v7 = vcombine.high %v197_v6, %v197_v6  ;;  %v241_v9 = vld [vmem:[%s750_s19] sm:$0x77]  ;;  %v202_v24 = vrot.slane %v197_v6, 5 }
  0x15   : > { %230 = vrot.lane.b32.xlu1 %v225_v3, %s698_s21  ;;  %v248_v8 = vrot.slane %v242_v5, 7  ;;  %v218_v10 = vld [vmem:[%s750_s19] sm:$0x77]  ;;  %v245_v12 = vcombine.high %v241_v9, %v241_v9  ;;  %v657_v14 = vld [vmem:[%s750_s19 + $0x8] ss:$0 sps:$4 sm:$0x77]  }
  0x16   : > { %v203_v11 = vrot.slane %v201_v7, 5  ;;  %v281_v13 = vld [vmem:[%s750_s19] sm:$0x77]  ;;  %v222_v15 = vcombine.high %v218_v10, %v218_v10  ;;  %v282_v21 = vld [vmem:[%s750_s19 + $0x8] sm:$0x7]  ;;  %v223_v25 = vrot.slane %v218_v10, 2 }
  0x17   : > { %209 = vrot.lane.b32.xlu0 %v204_v4, %s699_s22  ;;  %v247_v16 = vrot.slane %v245_v12, 7  ;;  %v285_v17 = vcombine.high %v281_v13, %v281_v13  ;;  %v191_v18 = vld [vmem:[%s750_s19] sm:$0x77]  ;;  %v288_v23 = vrot.slane %v282_v21, 1  ;;  %v246_v27 = vrot.slane %v241_v9, 7 }
  0x18   : > { %v193_v19 = vcombine.high %v191_v18, %v191_v18  ;;  %195 = vst [vmem:[#allocation2] sm:$0x7] %v191_v18  ;;  %v224_v20 = vrot.slane %v222_v15, 2  ;;  %v304_v26 = vld [vmem:[%s750_s19] sm:$0x77]  ;;  %v286_v31 = vrot.slane %v281_v13, 1 }
  0x19   : > { %253 = vrot.lane.b32.xlu1 %v248_v8, %s700_s23  ;;  %v287_v22 = vrot.slane %v285_v17, 1  ;;  %v308_v29 = vcombine.high %v304_v26, %v304_v26  ;;  %v325_v30 = vld [vmem:[%s750_s19] sm:$0x77]  ;;  %v305_v32 = vld [vmem:[%s750_s19 + $0x8] sm:$0x7]  ;;  %v309_v45 = vrot.slane %v304_v26, 6 }
  0x1a   : > { %196 = vst [vmem:[#allocation2 + $0x8] sm:$0x7] %v193_v19  ;;  %v329_v35 = vcombine.high %v325_v30, %v325_v30  ;;  %v311_v37 = vrot.slane %v305_v32, 6  ;;  %v326_v39 = vld [vmem:[%s750_s19 + $0x8] sm:$0x7]  ;;  %v330_v46 = vrot.slane %v325_v30, 3 }
  0x1b   : > { %207 = vrot.lane.b32.xlu0 %v203_v11, %s699_s22  ;;  %v310_v34 = vrot.slane %v308_v29, 6  ;;  %v346_v41 = vld [vmem:[%s750_s19] sm:$0x77]  ;;  %v332_v42 = vrot.slane %v326_v39, 3  ;;  %v347_v44 = vld [vmem:[%s750_s19 + $0x8] sm:$0x7] }
  0x1c   : > { %v331_v40 = vrot.slane %v329_v35, 3  ;;  %v350_v43 = vcombine.high %v346_v41, %v346_v41  ;;  %v467_v39 = vshrl.u32 %v364_v33, 7 }
  0x1d   : > { %272 = vrot.lane.b32.xlu1 %v657_v14, %s697_s20 }
  0x1f   : > { %251 = vrot.lane.b32.xlu0 %v247_v16, %s700_s23 }
  0x21   : > { %228 = vrot.lane.b32.xlu1 %v224_v20, %s698_s21 }
  0x23   : > { %291 = vrot.lane.b32.xlu0 %v287_v22, %s701_s24 }
  0x25   : > { %293 = vrot.lane.b32.xlu1 %v288_v23, %s701_s24 }
  0x27   : > { %205 = vrot.lane.b32.xlu0 %v202_v24, %s699_s22 }
  0x29   : > { %226 = vrot.lane.b32.xlu1 %v223_v25, %s698_s21 }
  0x2b   : > { %249 = vrot.lane.b32.xlu0 %v246_v27, %s700_s23 }
  0x2d   : > { %268 = vrot.lane.b32.xlu1 %v266_v28, %s697_s20 }
  0x2f   : > { %289 = vrot.lane.b32.xlu0 %v286_v31, %s701_s24 }
  0x31   : > { %314 = vrot.lane.b32.xlu1 %v310_v34, %s703_s27 }
  0x33   : > { %316 = vrot.lane.b32.xlu0 %v311_v37, %s703_s27  ;;  %v371_v37 = vld [vmem:[%s821_s2] sm:$0xff] }
  0x35   : > { %335 = vrot.lane.b32.xlu1 %v331_v40, %s704_s28  ;;  %v468_v40 = vsub.s32 0, %v467_v39 }
  0x37   : > { %337 = vrot.lane.b32.xlu0 %v332_v42, %s704_s28  ;;  %v469_v42 = vrot.slane %v778_v36, %v468_v40 }
  0x39   : > { %353 = vrot.lane.b32.xlu1 %v350_v43, %s705_s29 }
  0x3b   : > { %355 = vrot.lane.b32.xlu0 %v347_v44, %s705_s29 }
  0x3d   : > { %312 = vrot.lane.b32.xlu1 %v309_v45, %s703_s27 }
  0x3f   : > { %333 = vrot.lane.b32.xlu0 %v330_v46, %s704_s28 }
  0x41   : > { %351 = vrot.lane.b32.xlu1 %v346_v41, %s705_s29  ;;  %v472_v41 = vsub.s32 1, %v467_v39 }
  0x43   : > { %v473_v43 = vrot.slane %v778_v36, %v472_v41 }
  0x85   : > { %v271_v47 = vpop.permute.xlu0 %270 }
  0x87   : > { %v231_v48 = vpop.permute.xlu1 %230 }
  0x89   : > { %v210_v49 = vpop.permute.xlu0 %209 }
  0x8b   : > { %v254_v50 = vpop.permute.xlu1 %253 }
  0x8d   : > { %v208_v51 = vpop.permute.xlu0 %207 }
  0x8e   : > { %v213_v52 = vsel %vm211_vm1, %v208_v51, %v210_v49 }
  0x8f   : > { %217 = vst [vmem:[#allocation2 + $0x8] sm:$0x38] %v213_v52  ;;  %v273_v53 = vpop.permute.xlu1 %272 }
  0x90   : > { %v276_v54 = vsel %vm274_vm2, %v271_v47, %v273_v53 }
  0x91   : > { %280 = vst [vmem:[#allocation2 + $0x18] sm:$0x70] %v276_v54  ;;  %v252_v55 = vpop.permute.xlu0 %251 }
  0x92   : > { %v257_v56 = vsel %vm255_vm3, %v252_v55, %v254_v50 }
  0x93   : > { %261 = vst [vmem:[#allocation2 + $0x18] sm:$0xe] %v257_v56  ;;  %v229_v57 = vpop.permute.xlu1 %228 }
  0x94   : > { %v234_v58 = vsel %vm232_vm4, %v229_v57, %v231_v48 }
  0x95   : > { %238 = vst [vmem:[#allocation2 + $0x18] ss:$-12 sps:$4 sm:$0xc1] %v234_v58   ;;  %v292_v59 = vpop.permute.xlu0 %291 }
  0x97   : > { %v294_v60 = vpop.permute.xlu1 %293 }
  0x98   : > { %v297_v61 = vsel %vm295_vm5, %v292_v59, %v294_v60 }
  0x99   : > { %301 = vst [vmem:[#allocation2 + $0x28] ss:$-12 sps:$4 sm:$0x83] %v297_v61   ;;  %v206_v62 = vpop.permute.xlu0 %205 }
  0x9a   : > { %v212_v63 = vsel %vm211_vm1, %v206_v62, %v208_v51 }
  0x9b   : > { %216 = vst [vmem:[#allocation2] sm:$0x38] %v212_v63  ;;  %v227_v0 = vpop.permute.xlu1 %226 }
  0x9c   : > { %v233_v1 = vsel %vm232_vm4, %v227_v0, %v229_v57  ;;  %v374_v6 = vld [vmem:[#allocation2 + $0x8] sm:$0xff] }
  0x9d   : > { %237 = vst [vmem:[#allocation2 + $0x10] ss:$-12 sps:$4 sm:$0xc1] %v233_v1   ;;  %v250_v2 = vpop.permute.xlu0 %249 }
  0x9e   : > { %v256_v3 = vsel %vm255_vm3, %v250_v2, %v252_v55 }
  0x9f   : > { %260 = vst [vmem:[#allocation2 + $0x10] sm:$0xe] %v256_v3  ;;  %v269_v4 = vpop.permute.xlu1 %268 }
  0xa0   : > { %v275_v5 = vsel %vm274_vm2, %v269_v4, %v271_v47  ;;  %v376_v7 = vld [vmem:[#allocation2 + $0x18] sm:$0xff] }
  0xa1   : > { %279 = vst [vmem:[#allocation2 + $0x10] sm:$0x70] %v275_v5  ;;  %v290_v8 = vpop.permute.xlu0 %289  ;;  %v609_v9 = vpack.c.bf16 %v376_v7, %v374_v6 }
  0xa2   : > { %v296_v10 = vsel %vm295_vm5, %v290_v8, %v292_v59 }
  0xa3   : > { %300 = vst [vmem:[#allocation2 + $0x20] ss:$-12 sps:$4 sm:$0x83] %v296_v10   ;;  %v315_v11 = vpop.permute.xlu1 %314  ;;  %610 = vmatprep.subr.bf16.mxu0 %v609_v9  ;;  %617 = vmatprep.subr.bf16.mxu1 %v609_v9 }
  0xa4   : > { %v373_v17 = vld [vmem:[#allocation2] sm:$0xff] }
  0xa5   : > { %v317_v12 = vpop.permute.xlu0 %316 }
  0xa6   : > { %v320_v13 = vsel %vm318_vm6, %v315_v11, %v317_v12 }
  0xa7   : > { %324 = vst [vmem:[#allocation2 + $0x28] sm:$0x1c] %v320_v13  ;;  %v336_v14 = vpop.permute.xlu1 %335 }
  0xa9   : > { %v338_v15 = vpop.permute.xlu0 %337 }
  0xaa   : > { %v341_v16 = vsel %vm339_vm7, %v336_v14, %v338_v15  ;;  %v375_v18 = vld [vmem:[#allocation2 + $0x10] sm:$0xff] }
  0xab   : > { %345 = vst [vmem:[#allocation2 + $0x28] sm:$0xe0] %v341_v16  ;;  %v354_v19 = vpop.permute.xlu1 %353  ;;  %v611_v20 = vpack.c.bf16 %v375_v18, %v373_v17 }
  0xad   : > { %v356_v21 = vpop.permute.xlu0 %355  ;;  %612 = vmatpush1.bf16.msra.mxu0 %v611_v20  ;;  %619 = vmatpush1.bf16.msra.mxu1 %v611_v20 }
  0xae   : > { %v359_v22 = vsel %vm357_vm8, %v354_v19, %v356_v21 }
  0xaf   : > { %363 = vst [vmem:[#allocation2 + $0x38] sm:$0x7] %v359_v22  ;;  %v313_v23 = vpop.permute.xlu1 %312 }
  0xb0   : > { %v319_v24 = vsel %vm318_vm6, %v313_v23, %v315_v11 }
  0xb1   : > { %323 = vst [vmem:[#allocation2 + $0x20] sm:$0x1c] %v319_v24  ;;  %v334_v25 = vpop.permute.xlu0 %333 }
  0xb2   : > { %v340_v26 = vsel %vm339_vm7, %v334_v25, %v336_v14  ;;  %v378_v29 = vld [vmem:[#allocation2 + $0x28] sm:$0xff] }
  0xb3   : > { %344 = vst [vmem:[#allocation2 + $0x20] sm:$0xe0] %v340_v26  ;;  %v352_v27 = vpop.permute.xlu1 %351 }
  0xb4   : > { %v358_v28 = vsel %vm357_vm8, %v352_v27, %v354_v19 }
  0xb5   : > { %362 = vst [vmem:[#allocation2 + $0x30] sm:$0x7] %v358_v28 }
  0xb6   : > { %v380_v30 = vld [vmem:[#allocation2 + $0x38] sm:$0xff] }
  0xb7   : > { %v613_v31 = vpack.c.bf16 %v380_v30, %v378_v29 }
  0xb9   : > { %614 = vmatprep.subr.bf16.mxu0 %v613_v31  ;;  %618 = vmatprep.subr.bf16.mxu1 %v613_v31 }
  0xba   : > { %v377_v32 = vld [vmem:[#allocation2 + $0x20] sm:$0xff] }
  0xbc   : > { %v379_v34 = vld [vmem:[#allocation2 + $0x30] sm:$0xff] }
  0xbd   : > { %v615_v35 = vpack.c.bf16 %v379_v34, %v377_v32 }
  0xbf   : > { %616 = vmatpush1.bf16.msra.mxu0 %v615_v35  ;;  %620 = vmatpush1.bf16.msra.mxu1 %v615_v35 }
  0xc2   : > { %604 = vmatmul.mubr.msk.f32.vlgmr.msra.gmra.mrb[0].mxu0 %vm381_vm9, %v371_v37  ;;  %605 = vmatmul.mubr.msk.f32.vlgmr.msra.gmra.mrb[0].mxu1 %vm381_vm9, %v372_v38 }
 0x195   : > { %v454_v44 = vpop.f32.mrb[0].mxu0  ;;  %v460_v45 = vpop.f32.mrb[0].mxu1 }
 0x196   : > { %v476_v46 = vmul.f32 %v469_v42, %v454_v44  ;;  %v478_v47 = vmul.f32 %v469_v42, %v460_v45  ;;  %v456_v48 = vpop.f32.mrb[1].mxu0  ;;  %v462_v49 = vpop.f32.mrb[1].mxu1 }
 0x197   : > { %v477_v50 = vmul.f32 %v473_v43, %v456_v48  ;;  %v479_v51 = vmul.f32 %v473_v43, %v462_v49 }
 0x198   : > { %v484_v52 = vmul.f32 0.044715, %v476_v46  ;;  %v486_v53 = vmul.f32 0.044715, %v478_v47  ;;  %v482_v8 = vmul.f32 0.5, %v478_v47  ;;  %v480_v15 = vmul.f32 0.5, %v476_v46 }
 0x199   : > { %v485_v54 = vmul.f32 0.044715, %v477_v50  ;;  %v487_v55 = vmul.f32 0.044715, %v479_v51  ;;  %v483_v11 = vmul.f32 0.5, %v479_v51  ;;  %v481_v18 = vmul.f32 0.5, %v477_v50 }
 0x19a   : > { %v488_v56 = vmul.f32 %v484_v52, %v476_v46  ;;  %v490_v33 = vmul.f32 %v486_v53, %v478_v47 }
 0x19b   : > { %v489_v57 = vmul.f32 %v485_v54, %v477_v50  ;;  %v491_v58 = vmul.f32 %v487_v55, %v479_v51 }
 0x19c   : > { %v494_v59 = vmul.f32 %v490_v33, %v478_v47  ;;  %v492_v60 = vmul.f32 %v488_v56, %v476_v46 }
 0x19d   : > { %v495_v61 = vmul.f32 %v491_v58, %v479_v51  ;;  %v493_v36 = vmul.f32 %v489_v57, %v477_v50 }
 0x19e   : > { %v498_v62 = vadd.f32 %v494_v59, %v478_v47  ;;  %v496_v63 = vadd.f32 %v492_v60, %v476_v46 }
 0x19f   : > { %v499_v0 = vadd.f32 %v495_v61, %v479_v51  ;;  %v497_v1 = vadd.f32 %v493_v36, %v477_v50 }
 0x1a0   : > { %v502_v2 = vmul.f32 0.7978846, %v498_v62  ;;  %v500_v3 = vmul.f32 0.7978846, %v496_v63 }
 0x1a1   : > { %v503_v4 = vmul.f32 0.7978846, %v499_v0  ;;  %v501_v5 = vmul.f32 0.7978846, %v497_v1 }
 0x1a2   : > { %665 = vtanh.f32 %v502_v2 }
 0x1a3   : > { %667 = vtanh.f32 %v503_v4 }
 0x1a4   : > { %669 = vtanh.f32 %v500_v3 }
 0x1a5   : > { %671 = vtanh.f32 %v501_v5 }
 0x1ac   : > { %v666_v6 = vpop.eup %665 }
 0x1ad   : > { %v668_v7 = vpop.eup %667  ;;  %v510_v9 = vadd.f32 1.0, %v666_v6 }
 0x1ae   : > { %v670_v10 = vpop.eup %669  ;;  %v511_v12 = vadd.f32 1.0, %v668_v7 }
 0x1af   : > { %v672_v13 = vpop.eup %671  ;;  %v514_v14 = vmul.f32 %v510_v9, %v482_v8  ;;  %v508_v16 = vadd.f32 1.0, %v670_v10 }
 0x1b0   : > { %v515_v17 = vmul.f32 %v511_v12, %v483_v11  ;;  %v509_v19 = vadd.f32 1.0, %v672_v13 }
 0x1b1   : > { %v512_v20 = vmul.f32 %v508_v16, %v480_v15 }
 0x1b2   : > { %v519_v21 = vadd.f32 %v515_v17, %v514_v14  ;;  %v513_v22 = vmul.f32 %v509_v19, %v481_v18 }
 0x1b4   : > { %520 = vadd.xlane.f32.xlu1 %v519_v21  ;;  %v516_v23 = vadd.f32 %v513_v22, %v512_v20 }
 0x1b6   : > { %517 = vadd.xlane.f32.xlu0 %v516_v23 }
 0x241   : > { %v521_v24 = vpop.xlane.xlu1 %520 }
 0x242   : > { %v525_v25 = vmul.f32 0.0051020407, %v521_v24 }
 0x243   : > { %v518_v26 = vpop.xlane.xlu0 %517 }
 0x244   : > { %528 = vst.msk [vmem:[%s186_s10 + $0x8] sm:$0xff] %vm526_vm10, %v525_v25  ;;  %v524_v27 = vmul.f32 0.0051020407, %v518_v26 }
 0x246   : > { %527 = vst.msk [vmem:[%s186_s10] sm:$0xff] %vm526_vm10, %v524_v27 }
 0x247 PF: > { %s13_s14 = sadd.s32 1, %s695_s14   ;;  %s823_s12 = smov %s691_s13 }
 0x248   : > { %p10_p5 = scmp.ge.s32.totalorder %s13_s14, 4   ;;  %s824_s13 = smov %s826_s15 }
 0x24a   :  { %12 = sbr.rel (!%p10_p5) target bundleno = 2 (0x2), region = 63 }

</bundles_post_ra>
